<compile_context>
chip_gen: v5e
topology: v5e:2x2
jax: 0.10.0
libtpu: 0.0.40
codegen_flags: <defaults>
</compile_context>

<pallas_src>
from functools import partial

import jax
import jax.numpy as jnp
from jax.experimental import pallas as pl
from jax.experimental.pallas import tpu as pltpu


def _round_up(x, m):
    return ((x + m - 1) // m) * m


def _l_spa_kernel(org_ref, enh_ref, wmap_ref, ph_ref, pwt_ref, out_ref, *, inv_c):
    """One grid step: block_B images -> one (Hp_pad, Wp_pad) weighted-E slab."""
    block_b, n_ch, _, _ = org_ref.shape
    P_h = ph_ref[...]                       # (Hp_pad, H)  f32, resident constant
    P_wT = pwt_ref[...]                     # (W, Wp_pad)  f32, resident constant
    hp_pad = P_h.shape[0]
    wp_pad = P_wT.shape[1]

    e_acc = jnp.zeros((hp_pad, wp_pad), jnp.float32)

    for bb in range(block_b):
        # Channel-mean difference, accumulated channel-by-channel so only one
        # (H, W) f32 slab stays live (no wholesale f32 copy of (C, H, W)).
        d_full = (org_ref[bb, 0].astype(jnp.float32)
                  - enh_ref[bb, 0].astype(jnp.float32))
        for c in range(1, n_ch):
            d_full = d_full + (org_ref[bb, c].astype(jnp.float32)
                               - enh_ref[bb, c].astype(jnp.float32))
        d_full = d_full * inv_c

        # AvgPool2d(patch) as two small MXU matmuls into a zero-padded,
        # lane-dense (Hp_pad, Wp_pad) slab (zero outside the valid Hp x Wp).
        d = jnp.dot(P_h,
                    jnp.dot(d_full, P_wT, preferred_element_type=jnp.float32),
                    preferred_element_type=jnp.float32)
        w_pool = jnp.dot(P_h,
                         jnp.dot(wmap_ref[bb].astype(jnp.float32), P_wT,
                                 preferred_element_type=jnp.float32),
                         preferred_element_type=jnp.float32)

        # Four directional 3x3 convs == +/-1 neighbour shifts (XLU rolls).
        # Cyclic rolls wrap through the all-zero padding row/column (== the
        # conv's zero padding); padded-region garbage is multiplied by
        # w_pool == 0 below.  Interleaved roll->diff->square->add keeps the
        # number of live pooled-size f32 slabs small.
        e = jnp.zeros_like(d)
        for shift, axis in ((1, 1), (wp_pad - 1, 1), (1, 0), (hp_pad - 1, 0)):
            n = pltpu.roll(d, shift, axis=axis)
            e = e + (d - n) ** 2
        e_acc = e_acc + e * w_pool

    # One lane-dense VMEM write per grid step; no cross-step carry, so the
    # grid axis can be sharded across TensorCores ("parallel").
    out_ref[0] = e_acc


def l_spa(org, enhance, weight_map, patch_size, *,
          input_dtype=jnp.bfloat16, max_block_b=16):
    """Pallas implementation of L_spa.forward(org, enhance, weight_map)."""
    B, C, H, W = org.shape
    assert enhance.shape == org.shape
    assert H % patch_size == 0 and W % patch_size == 0
    Hp, Wp = H // patch_size, W // patch_size

    # Padded pooled dims: lane dim multiple of 128, sublane multiple of 8, and
    # at least one extra all-zero row/column so the cyclic rolls wrap through
    # zeros.  Do NOT remove the +1 even when Hp/Wp are already aligned.
    Hp_pad = _round_up(Hp + 1, 8)
    Wp_pad = _round_up(Wp + 1, 128)

    # Host-precomputed pooling matrices (rows/cols beyond Hp/Wp are zero).
    row = jnp.arange(Hp_pad, dtype=jnp.int32)[:, None]
    col_h = jnp.arange(H, dtype=jnp.int32)[None, :]
    P_h = jnp.where(col_h // patch_size == row,
                    1.0 / patch_size, 0.0).astype(jnp.float32)      # (Hp_pad, H)
    row_w = jnp.arange(W, dtype=jnp.int32)[:, None]
    col = jnp.arange(Wp_pad, dtype=jnp.int32)[None, :]
    P_wT = jnp.where(row_w // patch_size == col,
                     1.0 / patch_size, 0.0).astype(jnp.float32)     # (W, Wp_pad)

    wm = weight_map.reshape(B, H, W)

    # Cast the big streamed inputs at the pallas_call boundary (bf16 halves the
    # HBM traffic; in-kernel accumulation stays f32).
    if input_dtype is not None:
        org = org.astype(input_dtype)
        enhance = enhance.astype(input_dtype)
        wm = wm.astype(input_dtype)

    itemsize = jnp.dtype(org.dtype).itemsize
    per_image_bytes = (2 * C + 1) * H * W * itemsize

    # Generation-aware VMEM limit (v7x: 64 MiB/TC, v5e/v6e: 128 MiB).
    try:
        vmem_cap = int(getattr(pltpu.get_tpu_info(), "vmem_capacity_bytes",
                               64 * 1024 * 1024))
    except Exception:
        vmem_cap = 64 * 1024 * 1024
    vmem_limit = max(32 * 1024 * 1024, vmem_cap - (16 * 1024 * 1024))

    # Batch-block size: fill ~half the limit with the two double-buffered input
    # slabs, leaving headroom for f32 intermediates, constants and the output.
    intermediates = (6 * H * W + 6 * Hp_pad * Wp_pad
                     + Hp_pad * H + W * Wp_pad) * 4
    budget = max(vmem_limit // 2 - intermediates, 2 * per_image_bytes)
    block_B = int(min(max(budget // (2 * per_image_bytes), 1), B, max_block_b))

    # Pad B with zero images (zero weight map => zero contribution).
    B_pad = _round_up(B, block_B)
    if B_pad != B:
        org = jnp.pad(org, ((0, B_pad - B), (0, 0), (0, 0), (0, 0)))
        enhance = jnp.pad(enhance, ((0, B_pad - B), (0, 0), (0, 0), (0, 0)))
        wm = jnp.pad(wm, ((0, B_pad - B), (0, 0), (0, 0)))
    num_blocks = B_pad // block_B

    cost = pl.CostEstimate(
        flops=int(B_pad * (2 * C * H * W                 # channel-mean diff
                           + 4 * H * W * Wp_pad          # W-pool matmuls (x2)
                           + 4 * Hp_pad * H * Wp_pad     # H-pool matmuls (x2)
                           + 14 * Hp_pad * Wp_pad)),     # rolls/squares/accum
        transcendentals=0,
        bytes_accessed=int(B_pad * per_image_bytes
                           + (Hp_pad * H + W * Wp_pad) * 4
                           + num_blocks * Hp_pad * Wp_pad * 4),
    )

    partials = pl.pallas_call(
        partial(_l_spa_kernel, inv_c=1.0 / C),
        out_shape=jax.ShapeDtypeStruct((num_blocks, Hp_pad, Wp_pad), jnp.float32),
        grid=(num_blocks,),
        in_specs=[
            pl.BlockSpec((block_B, C, H, W), lambda b: (b, 0, 0, 0)),
            pl.BlockSpec((block_B, C, H, W), lambda b: (b, 0, 0, 0)),
            pl.BlockSpec((block_B, H, W), lambda b: (b, 0, 0)),
            # Constants: same block index every step -> stay resident in VMEM
            # (no re-DMA between steps).
            pl.BlockSpec((Hp_pad, H), lambda b: (0, 0)),
            pl.BlockSpec((W, Wp_pad), lambda b: (0, 0)),
        ],
        out_specs=pl.BlockSpec((1, Hp_pad, Wp_pad), lambda b: (b, 0, 0)),
        compiler_params=pltpu.CompilerParams(
            # No cross-step carry -> batch axis can be sharded across v7x's
            # two TensorCores; on single-TC parts it is just a sequential loop.
            dimension_semantics=("parallel",),
            vmem_limit_bytes=int(vmem_limit),
        ),
        cost_estimate=cost,
    )(org, enhance, wm, P_h, P_wT)

    # Tiny cross-block + spatial reduction, then torch.mean's divisor
    # (original, un-padded B).
    return jnp.sum(partials) * (1.0 / (B * Hp * Wp))


# --- plain-JAX reference (mirrors the PyTorch module op-for-op) -------------
def l_spa_ref(org, enhance, weight_map, patch):
    org_mean = jnp.mean(org, axis=1, keepdims=True)
    enh_mean = jnp.mean(enhance, axis=1, keepdims=True)

    def pool(x):
        B, C, H, W = x.shape
        return x.reshape(B, C, H // patch, patch, W // patch, patch).mean(axis=(3, 5))

    op, ep, wp = pool(org_mean), pool(enh_mean), pool(weight_map)

    def conv(x, k2d):
        k = jnp.asarray(k2d, jnp.float32).reshape(1, 1, 3, 3)
        return jax.lax.conv_general_dilated(
            x, k, (1, 1), ((1, 1), (1, 1)),
            dimension_numbers=('NCHW', 'OIHW', 'NCHW'))

    k_left = [[0, 0, 0], [-1, 1, 0], [0, 0, 0]]
    k_right = [[0, 0, 0], [0, 1, -1], [0, 0, 0]]
    k_up = [[0, -1, 0], [0, 1, 0], [0, 0, 0]]
    k_down = [[0, 0, 0], [0, 1, 0], [0, -1, 0]]

    E = 0.0
    for k in (k_left, k_right, k_up, k_down):
        E = E + (conv(op, k) - conv(ep, k)) ** 2
    return jnp.mean(E * wp)


if __name__ == "__main__":
    key = jax.random.PRNGKey(0)
    k1, k2, k3 = jax.random.split(key, 3)

    B, C, H, W = 2, 4, 16, 16
    patch_size = 4

    org = jax.random.uniform(k1, (B, C, H, W), jnp.float32)
    enhance = jax.random.uniform(k2, (B, C, H, W), jnp.float32)
    weight_map = jax.random.uniform(k3, (B, 1, H, W), jnp.float32)

    # 1) full-precision path: exact semantics of the PyTorch module.
    out_f32 = jax.block_until_ready(
        l_spa(org, enhance, weight_map, patch_size, input_dtype=None))
    ref_f32 = l_spa_ref(org, enhance, weight_map, patch_size)
    assert jnp.allclose(out_f32, ref_f32, rtol=1e-5, atol=1e-5), (out_f32, ref_f32)

    # 2) default bf16-fed (perf) path: compare against the reference computed
    #    from the same bf16-quantized inputs (in-kernel math is f32).
    out_bf = jax.block_until_ready(l_spa(org, enhance, weight_map, patch_size))
    q = lambda x: x.astype(jnp.bfloat16).astype(jnp.float32)
    ref_bf = l_spa_ref(q(org), q(enhance), q(weight_map), patch_size)
    assert jnp.allclose(out_bf, ref_bf, rtol=1e-4, atol=1e-5), (out_bf, ref_bf)

    # 3) multi-block + padded-batch + "parallel" axis path.
    B2 = 5
    kk1, kk2, kk3 = jax.random.split(jax.random.PRNGKey(1), 3)
    org2 = jax.random.uniform(kk1, (B2, C, H, W), jnp.float32)
    enh2 = jax.random.uniform(kk2, (B2, C, H, W), jnp.float32)
    wmap2 = jax.random.uniform(kk3, (B2, 1, H, W), jnp.float32)
    out2 = jax.block_until_ready(
        l_spa(org2, enh2, wmap2, patch_size, input_dtype=None, max_block_b=2))
    ref2 = l_spa_ref(org2, enh2, wmap2, patch_size)
    assert jnp.allclose(out2, ref2, rtol=1e-5, atol=1e-5), (out2, ref2)

    print("KERNEL_OK")
</pallas_src>

<mosaic_0001>
module attributes {stable_mosaic.version = 11 : i64} {
  func.func @_l_spa_kernel(%arg0: i32, %arg1: memref<2x4x16x16xf32, #tpu.memory_space<vmem>>, %arg2: memref<2x4x16x16xf32, #tpu.memory_space<vmem>>, %arg3: memref<2x16x16xf32, #tpu.memory_space<vmem>>, %arg4: memref<8x16xf32, #tpu.memory_space<vmem>>, %arg5: memref<16x128xf32, #tpu.memory_space<vmem>>, %arg6: memref<1x8x128xf32, #tpu.memory_space<vmem>>) attributes {dimension_semantics = [#tpu.dimension_semantics<parallel>], iteration_bounds = array<i64: 1>, scalar_prefetch = 0 : i64, scratch_operands = 0 : i64, tpu.core_type = #tpu.core_type<tc>, window_params = [{transform_indices = @transform_0, window_bounds = array<i64: 2, 4, 16, 16>}, {transform_indices = @transform_1, window_bounds = array<i64: 2, 4, 16, 16>}, {transform_indices = @transform_2, window_bounds = array<i64: 2, 16, 16>}, {pipeline_mode = #tpu.pipeline_mode<synchronous>, transform_indices = @transform_3, window_bounds = array<i64: 8, 16>}, {pipeline_mode = #tpu.pipeline_mode<synchronous>, transform_indices = @transform_4, window_bounds = array<i64: 16, 128>}, {transform_indices = @transform_5, window_bounds = array<i64: 1, 8, 128>}]} {
    %c0 = arith.constant 0 : index
    %c0_0 = arith.constant 0 : index
    %0 = vector.load %arg4[%c0, %c0_0] : memref<8x16xf32, #tpu.memory_space<vmem>>, vector<8x16xf32>
    %c0_1 = arith.constant 0 : index
    %c0_2 = arith.constant 0 : index
    %1 = vector.load %arg5[%c0_1, %c0_2] : memref<16x128xf32, #tpu.memory_space<vmem>>, vector<16x128xf32>
    %cst = arith.constant 0.000000e+00 : f32
    %2 = vector.broadcast %cst : f32 to vector<8x128xf32>
    %c0_3 = arith.constant 0 : index
    %c0_4 = arith.constant 0 : index
    %c0_5 = arith.constant 0 : index
    %c0_6 = arith.constant 0 : index
    %3 = vector.load %arg1[%c0_3, %c0_4, %c0_5, %c0_6] : memref<2x4x16x16xf32, #tpu.memory_space<vmem>>, vector<1x1x16x16xf32>
    %4 = vector.shape_cast %3 : vector<1x1x16x16xf32> to vector<16x16xf32>
    %c0_7 = arith.constant 0 : index
    %c0_8 = arith.constant 0 : index
    %c0_9 = arith.constant 0 : index
    %c0_10 = arith.constant 0 : index
    %5 = vector.load %arg2[%c0_7, %c0_8, %c0_9, %c0_10] : memref<2x4x16x16xf32, #tpu.memory_space<vmem>>, vector<1x1x16x16xf32>
    %6 = vector.shape_cast %5 : vector<1x1x16x16xf32> to vector<16x16xf32>
    %7 = arith.subf %4, %6 : vector<16x16xf32>
    %c0_11 = arith.constant 0 : index
    %c1 = arith.constant 1 : index
    %c0_12 = arith.constant 0 : index
    %c0_13 = arith.constant 0 : index
    %8 = vector.load %arg1[%c0_11, %c1, %c0_12, %c0_13] : memref<2x4x16x16xf32, #tpu.memory_space<vmem>>, vector<1x1x16x16xf32>
    %9 = vector.shape_cast %8 : vector<1x1x16x16xf32> to vector<16x16xf32>
    %c0_14 = arith.constant 0 : index
    %c1_15 = arith.constant 1 : index
    %c0_16 = arith.constant 0 : index
    %c0_17 = arith.constant 0 : index
    %10 = vector.load %arg2[%c0_14, %c1_15, %c0_16, %c0_17] : memref<2x4x16x16xf32, #tpu.memory_space<vmem>>, vector<1x1x16x16xf32>
    %11 = vector.shape_cast %10 : vector<1x1x16x16xf32> to vector<16x16xf32>
    %12 = arith.subf %9, %11 : vector<16x16xf32>
    %13 = arith.addf %7, %12 : vector<16x16xf32>
    %c0_18 = arith.constant 0 : index
    %c2 = arith.constant 2 : index
    %c0_19 = arith.constant 0 : index
    %c0_20 = arith.constant 0 : index
    %14 = vector.load %arg1[%c0_18, %c2, %c0_19, %c0_20] : memref<2x4x16x16xf32, #tpu.memory_space<vmem>>, vector<1x1x16x16xf32>
    %15 = vector.shape_cast %14 : vector<1x1x16x16xf32> to vector<16x16xf32>
    %c0_21 = arith.constant 0 : index
    %c2_22 = arith.constant 2 : index
    %c0_23 = arith.constant 0 : index
    %c0_24 = arith.constant 0 : index
    %16 = vector.load %arg2[%c0_21, %c2_22, %c0_23, %c0_24] : memref<2x4x16x16xf32, #tpu.memory_space<vmem>>, vector<1x1x16x16xf32>
    %17 = vector.shape_cast %16 : vector<1x1x16x16xf32> to vector<16x16xf32>
    %18 = arith.subf %15, %17 : vector<16x16xf32>
    %19 = arith.addf %13, %18 : vector<16x16xf32>
    %c0_25 = arith.constant 0 : index
    %c3 = arith.constant 3 : index
    %c0_26 = arith.constant 0 : index
    %c0_27 = arith.constant 0 : index
    %20 = vector.load %arg1[%c0_25, %c3, %c0_26, %c0_27] : memref<2x4x16x16xf32, #tpu.memory_space<vmem>>, vector<1x1x16x16xf32>
    %21 = vector.shape_cast %20 : vector<1x1x16x16xf32> to vector<16x16xf32>
    %c0_28 = arith.constant 0 : index
    %c3_29 = arith.constant 3 : index
    %c0_30 = arith.constant 0 : index
    %c0_31 = arith.constant 0 : index
    %22 = vector.load %arg2[%c0_28, %c3_29, %c0_30, %c0_31] : memref<2x4x16x16xf32, #tpu.memory_space<vmem>>, vector<1x1x16x16xf32>
    %23 = vector.shape_cast %22 : vector<1x1x16x16xf32> to vector<16x16xf32>
    %24 = arith.subf %21, %23 : vector<16x16xf32>
    %25 = arith.addf %19, %24 : vector<16x16xf32>
    %cst_32 = arith.constant 2.500000e-01 : f32
    %26 = vector.broadcast %cst_32 : f32 to vector<16x16xf32>
    %27 = arith.mulf %25, %26 : vector<16x16xf32>
    %cst_33 = arith.constant dense<0.000000e+00> : vector<16x128xf32>
    %28 = tpu.matmul %27, %1, %cst_33 {dimension_numbers = #tpu.dot_dimension_numbers<[1], [0], [0], [1], [0, 0, 1, 1], [], []>} : vector<16x16xf32>, vector<16x128xf32>, vector<16x128xf32> -> vector<16x128xf32>
    %cst_34 = arith.constant dense<0.000000e+00> : vector<8x128xf32>
    %29 = tpu.matmul %0, %28, %cst_34 {dimension_numbers = #tpu.dot_dimension_numbers<[1], [0], [0], [1], [0, 0, 1, 1], [], []>} : vector<8x16xf32>, vector<16x128xf32>, vector<8x128xf32> -> vector<8x128xf32>
    %c0_35 = arith.constant 0 : index
    %c0_36 = arith.constant 0 : index
    %c0_37 = arith.constant 0 : index
    %30 = vector.load %arg3[%c0_35, %c0_36, %c0_37] : memref<2x16x16xf32, #tpu.memory_space<vmem>>, vector<1x16x16xf32>
    %31 = vector.shape_cast %30 : vector<1x16x16xf32> to vector<16x16xf32>
    %cst_38 = arith.constant dense<0.000000e+00> : vector<16x128xf32>
    %32 = tpu.matmul %31, %1, %cst_38 {dimension_numbers = #tpu.dot_dimension_numbers<[1], [0], [0], [1], [0, 0, 1, 1], [], []>} : vector<16x16xf32>, vector<16x128xf32>, vector<16x128xf32> -> vector<16x128xf32>
    %cst_39 = arith.constant dense<0.000000e+00> : vector<8x128xf32>
    %33 = tpu.matmul %0, %32, %cst_39 {dimension_numbers = #tpu.dot_dimension_numbers<[1], [0], [0], [1], [0, 0, 1, 1], [], []>} : vector<8x16xf32>, vector<16x128xf32>, vector<8x128xf32> -> vector<8x128xf32>
    %cst_40 = arith.constant 0.000000e+00 : f32
    %34 = vector.broadcast %cst_40 : f32 to vector<8x128xf32>
    %c1_i32 = arith.constant 1 : i32
    %35 = tpu.dynamic_rotate %29 by %c1_i32 dim 1 : vector<8x128xf32>, i32 -> vector<8x128xf32>
    %36 = arith.subf %29, %35 : vector<8x128xf32>
    %37 = arith.mulf %36, %36 : vector<8x128xf32>
    %38 = arith.addf %34, %37 : vector<8x128xf32>
    %c127_i32 = arith.constant 127 : i32
    %39 = tpu.dynamic_rotate %29 by %c127_i32 dim 1 : vector<8x128xf32>, i32 -> vector<8x128xf32>
    %40 = arith.subf %29, %39 : vector<8x128xf32>
    %41 = arith.mulf %40, %40 : vector<8x128xf32>
    %42 = arith.addf %38, %41 : vector<8x128xf32>
    %c1_i32_41 = arith.constant 1 : i32
    %43 = tpu.dynamic_rotate %29 by %c1_i32_41 dim 0 : vector<8x128xf32>, i32 -> vector<8x128xf32>
    %44 = arith.subf %29, %43 : vector<8x128xf32>
    %45 = arith.mulf %44, %44 : vector<8x128xf32>
    %46 = arith.addf %42, %45 : vector<8x128xf32>
    %c7_i32 = arith.constant 7 : i32
    %47 = tpu.dynamic_rotate %29 by %c7_i32 dim 0 : vector<8x128xf32>, i32 -> vector<8x128xf32>
    %48 = arith.subf %29, %47 : vector<8x128xf32>
    %49 = arith.mulf %48, %48 : vector<8x128xf32>
    %50 = arith.addf %46, %49 : vector<8x128xf32>
    %51 = arith.mulf %50, %33 : vector<8x128xf32>
    %52 = arith.addf %2, %51 : vector<8x128xf32>
    %c1_42 = arith.constant 1 : index
    %c0_43 = arith.constant 0 : index
    %c0_44 = arith.constant 0 : index
    %c0_45 = arith.constant 0 : index
    %53 = vector.load %arg1[%c1_42, %c0_43, %c0_44, %c0_45] : memref<2x4x16x16xf32, #tpu.memory_space<vmem>>, vector<1x1x16x16xf32>
    %54 = vector.shape_cast %53 : vector<1x1x16x16xf32> to vector<16x16xf32>
    %c1_46 = arith.constant 1 : index
    %c0_47 = arith.constant 0 : index
    %c0_48 = arith.constant 0 : index
    %c0_49 = arith.constant 0 : index
    %55 = vector.load %arg2[%c1_46, %c0_47, %c0_48, %c0_49] : memref<2x4x16x16xf32, #tpu.memory_space<vmem>>, vector<1x1x16x16xf32>
    %56 = vector.shape_cast %55 : vector<1x1x16x16xf32> to vector<16x16xf32>
    %57 = arith.subf %54, %56 : vector<16x16xf32>
    %c1_50 = arith.constant 1 : index
    %c1_51 = arith.constant 1 : index
    %c0_52 = arith.constant 0 : index
    %c0_53 = arith.constant 0 : index
    %58 = vector.load %arg1[%c1_50, %c1_51, %c0_52, %c0_53] : memref<2x4x16x16xf32, #tpu.memory_space<vmem>>, vector<1x1x16x16xf32>
    %59 = vector.shape_cast %58 : vector<1x1x16x16xf32> to vector<16x16xf32>
    %c1_54 = arith.constant 1 : index
    %c1_55 = arith.constant 1 : index
    %c0_56 = arith.constant 0 : index
    %c0_57 = arith.constant 0 : index
    %60 = vector.load %arg2[%c1_54, %c1_55, %c0_56, %c0_57] : memref<2x4x16x16xf32, #tpu.memory_space<vmem>>, vector<1x1x16x16xf32>
    %61 = vector.shape_cast %60 : vector<1x1x16x16xf32> to vector<16x16xf32>
    %62 = arith.subf %59, %61 : vector<16x16xf32>
    %63 = arith.addf %57, %62 : vector<16x16xf32>
    %c1_58 = arith.constant 1 : index
    %c2_59 = arith.constant 2 : index
    %c0_60 = arith.constant 0 : index
    %c0_61 = arith.constant 0 : index
    %64 = vector.load %arg1[%c1_58, %c2_59, %c0_60, %c0_61] : memref<2x4x16x16xf32, #tpu.memory_space<vmem>>, vector<1x1x16x16xf32>
    %65 = vector.shape_cast %64 : vector<1x1x16x16xf32> to vector<16x16xf32>
    %c1_62 = arith.constant 1 : index
    %c2_63 = arith.constant 2 : index
    %c0_64 = arith.constant 0 : index
    %c0_65 = arith.constant 0 : index
    %66 = vector.load %arg2[%c1_62, %c2_63, %c0_64, %c0_65] : memref<2x4x16x16xf32, #tpu.memory_space<vmem>>, vector<1x1x16x16xf32>
    %67 = vector.shape_cast %66 : vector<1x1x16x16xf32> to vector<16x16xf32>
    %68 = arith.subf %65, %67 : vector<16x16xf32>
    %69 = arith.addf %63, %68 : vector<16x16xf32>
    %c1_66 = arith.constant 1 : index
    %c3_67 = arith.constant 3 : index
    %c0_68 = arith.constant 0 : index
    %c0_69 = arith.constant 0 : index
    %70 = vector.load %arg1[%c1_66, %c3_67, %c0_68, %c0_69] : memref<2x4x16x16xf32, #tpu.memory_space<vmem>>, vector<1x1x16x16xf32>
    %71 = vector.shape_cast %70 : vector<1x1x16x16xf32> to vector<16x16xf32>
    %c1_70 = arith.constant 1 : index
    %c3_71 = arith.constant 3 : index
    %c0_72 = arith.constant 0 : index
    %c0_73 = arith.constant 0 : index
    %72 = vector.load %arg2[%c1_70, %c3_71, %c0_72, %c0_73] : memref<2x4x16x16xf32, #tpu.memory_space<vmem>>, vector<1x1x16x16xf32>
    %73 = vector.shape_cast %72 : vector<1x1x16x16xf32> to vector<16x16xf32>
    %74 = arith.subf %71, %73 : vector<16x16xf32>
    %75 = arith.addf %69, %74 : vector<16x16xf32>
    %cst_74 = arith.constant 2.500000e-01 : f32
    %76 = vector.broadcast %cst_74 : f32 to vector<16x16xf32>
    %77 = arith.mulf %75, %76 : vector<16x16xf32>
    %cst_75 = arith.constant dense<0.000000e+00> : vector<16x128xf32>
    %78 = tpu.matmul %77, %1, %cst_75 {dimension_numbers = #tpu.dot_dimension_numbers<[1], [0], [0], [1], [0, 0, 1, 1], [], []>} : vector<16x16xf32>, vector<16x128xf32>, vector<16x128xf32> -> vector<16x128xf32>
    %cst_76 = arith.constant dense<0.000000e+00> : vector<8x128xf32>
    %79 = tpu.matmul %0, %78, %cst_76 {dimension_numbers = #tpu.dot_dimension_numbers<[1], [0], [0], [1], [0, 0, 1, 1], [], []>} : vector<8x16xf32>, vector<16x128xf32>, vector<8x128xf32> -> vector<8x128xf32>
    %c1_77 = arith.constant 1 : index
    %c0_78 = arith.constant 0 : index
    %c0_79 = arith.constant 0 : index
    %80 = vector.load %arg3[%c1_77, %c0_78, %c0_79] : memref<2x16x16xf32, #tpu.memory_space<vmem>>, vector<1x16x16xf32>
    %81 = vector.shape_cast %80 : vector<1x16x16xf32> to vector<16x16xf32>
    %cst_80 = arith.constant dense<0.000000e+00> : vector<16x128xf32>
    %82 = tpu.matmul %81, %1, %cst_80 {dimension_numbers = #tpu.dot_dimension_numbers<[1], [0], [0], [1], [0, 0, 1, 1], [], []>} : vector<16x16xf32>, vector<16x128xf32>, vector<16x128xf32> -> vector<16x128xf32>
    %cst_81 = arith.constant dense<0.000000e+00> : vector<8x128xf32>
    %83 = tpu.matmul %0, %82, %cst_81 {dimension_numbers = #tpu.dot_dimension_numbers<[1], [0], [0], [1], [0, 0, 1, 1], [], []>} : vector<8x16xf32>, vector<16x128xf32>, vector<8x128xf32> -> vector<8x128xf32>
    %cst_82 = arith.constant 0.000000e+00 : f32
    %84 = vector.broadcast %cst_82 : f32 to vector<8x128xf32>
    %c1_i32_83 = arith.constant 1 : i32
    %85 = tpu.dynamic_rotate %79 by %c1_i32_83 dim 1 : vector<8x128xf32>, i32 -> vector<8x128xf32>
    %86 = arith.subf %79, %85 : vector<8x128xf32>
    %87 = arith.mulf %86, %86 : vector<8x128xf32>
    %88 = arith.addf %84, %87 : vector<8x128xf32>
    %c127_i32_84 = arith.constant 127 : i32
    %89 = tpu.dynamic_rotate %79 by %c127_i32_84 dim 1 : vector<8x128xf32>, i32 -> vector<8x128xf32>
    %90 = arith.subf %79, %89 : vector<8x128xf32>
    %91 = arith.mulf %90, %90 : vector<8x128xf32>
    %92 = arith.addf %88, %91 : vector<8x128xf32>
    %c1_i32_85 = arith.constant 1 : i32
    %93 = tpu.dynamic_rotate %79 by %c1_i32_85 dim 0 : vector<8x128xf32>, i32 -> vector<8x128xf32>
    %94 = arith.subf %79, %93 : vector<8x128xf32>
    %95 = arith.mulf %94, %94 : vector<8x128xf32>
    %96 = arith.addf %92, %95 : vector<8x128xf32>
    %c7_i32_86 = arith.constant 7 : i32
    %97 = tpu.dynamic_rotate %79 by %c7_i32_86 dim 0 : vector<8x128xf32>, i32 -> vector<8x128xf32>
    %98 = arith.subf %79, %97 : vector<8x128xf32>
    %99 = arith.mulf %98, %98 : vector<8x128xf32>
    %100 = arith.addf %96, %99 : vector<8x128xf32>
    %101 = arith.mulf %100, %83 : vector<8x128xf32>
    %102 = arith.addf %52, %101 : vector<8x128xf32>
    %c0_87 = arith.constant 0 : index
    %c0_88 = arith.constant 0 : index
    %c0_89 = arith.constant 0 : index
    %103 = vector.load %arg6[%c0_87, %c0_88, %c0_89] : memref<1x8x128xf32, #tpu.memory_space<vmem>>, vector<1x8x128xf32>
    %104 = vector.shape_cast %103 : vector<1x8x128xf32> to vector<8x128xf32>
    %105 = vector.shape_cast %102 : vector<8x128xf32> to vector<1x8x128xf32>
    tpu.vector_store %arg6[%c0_87, %c0_88, %c0_89], %105 {strides = array<i32>} : memref<1x8x128xf32, #tpu.memory_space<vmem>>, vector<1x8x128xf32>,
    return
  }
  func.func @transform_0(%arg0: i32) -> (i32, i32, i32, i32) {
    %c0_i32 = arith.constant 0 : i32
    %c0_i32_0 = arith.constant 0 : i32
    %c0_i32_1 = arith.constant 0 : i32
    %c0_i32_2 = arith.constant 0 : i32
    return %arg0, %c0_i32, %c0_i32_0, %c0_i32_1 : i32, i32, i32, i32
  }
  func.func @transform_1(%arg0: i32) -> (i32, i32, i32, i32) {
    %c0_i32 = arith.constant 0 : i32
    %c0_i32_0 = arith.constant 0 : i32
    %c0_i32_1 = arith.constant 0 : i32
    %c0_i32_2 = arith.constant 0 : i32
    return %arg0, %c0_i32, %c0_i32_0, %c0_i32_1 : i32, i32, i32, i32
  }
  func.func @transform_2(%arg0: i32) -> (i32, i32, i32) {
    %c0_i32 = arith.constant 0 : i32
    %c0_i32_0 = arith.constant 0 : i32
    %c0_i32_1 = arith.constant 0 : i32
    return %arg0, %c0_i32, %c0_i32_0 : i32, i32, i32
  }
  func.func @transform_3(%arg0: i32) -> (i32, i32) {
    %c0_i32 = arith.constant 0 : i32
    %c0_i32_0 = arith.constant 0 : i32
    %c0_i32_1 = arith.constant 0 : i32
    return %c0_i32, %c0_i32_0 : i32, i32
  }
  func.func @transform_4(%arg0: i32) -> (i32, i32) {
    %c0_i32 = arith.constant 0 : i32
    %c0_i32_0 = arith.constant 0 : i32
    %c0_i32_1 = arith.constant 0 : i32
    return %c0_i32, %c0_i32_0 : i32, i32
  }
  func.func @transform_5(%arg0: i32) -> (i32, i32, i32) {
    %c0_i32 = arith.constant 0 : i32
    %c0_i32_0 = arith.constant 0 : i32
    %c0_i32_1 = arith.constant 0 : i32
    return %arg0, %c0_i32, %c0_i32_0 : i32, i32, i32
  }
}

</mosaic_0001>

<bundles_post_ra>
// kernel: tpu_custom_call.1
= control target key start
LH: loop header
LB: loop body
LE: loop exit
PB: predicated region body
PF: predicated region fallthrough
CT: control target
= control target key end

     0   :  { %10 = vsyncpa [#allocation3], 0  ;;  %s703_s0 = inlined_call_operand.hbm [shape: f32[2,4,16,16], index: 0, kind: input, shape index: {}]   ;;  %s704_s1 = inlined_call_operand.hbm [shape: f32[2,4,16,16], index: 1, kind: input, shape index: {}]   ;;  %s705_s2 = inlined_call_operand.hbm [shape: f32[2,16,16], index: 2, kind: input, shape index: {}]   ;;  %s706_s3 = inlined_call_operand.hbm [shape: f32[8,16], index: 3, kind: input, shape index: {}]   ;;  %s707_s4 = inlined_call_operand.hbm [shape: f32[16,128], index: 4, kind: input, shape index: {}]   ;;  %s708_s5 = inlined_call_operand.hbm [shape: f32[1,8,128], index: 5, kind: output, shape index: {}]  }
   0x1   :  { %11 = vsyncpa [#allocation6], 0 }
   0x2   :  { %12 = vsyncpa [#allocation9], 0 }
   0x3   :  { %13 = vsyncpa [#allocation4], 0  ;;  %s31_s20 = sshll.u32 %s704_s1, 4  ;;  %s619_s21 = smov [#allocation5]   ;;  %s32_s20 = int_to_ptr.hbm [resolvable:$true] %s31_s20 }
   0x4   :  { %s33_s22 = sshll.u32 %s619_s21, 4  ;;  %s58_s25 = sshll.u32 %s706_s3, 4  ;;  %s34_s22 = int_to_ptr.vmem [resolvable:$true] %s33_s22  ;;  %s59_s25 = int_to_ptr.hbm [resolvable:$true] %s58_s25 }
   0x5   :  { %s620_s26 = smov 128   ;;  %s621_s27 = smov 8  }
   0x6   :  { %39 = dma.hbm_to_vmem [thread:$0]  %s32_s20, 2048, %s34_s22, [#allocation6], %s620_s26, %s620_s26, %s621_s27  }
   0x7   :  { %s622_s28 = smov [#allocation8]   ;;  %s18_s7 = sshll.u32 %s703_s0, 4  ;;  %s19_s7 = int_to_ptr.hbm [resolvable:$true] %s18_s7 }
   0x8   :  { %s60_s29 = sshll.u32 %s622_s28, 4  ;;  %s44_s9 = sshll.u32 %s705_s2, 4  ;;  %s61_s29 = int_to_ptr.vmem [resolvable:$true] %s60_s29  ;;  %s45_s9 = int_to_ptr.hbm [resolvable:$true] %s44_s9 }
   0x9   :  { %63 = dma.hbm_to_vmem [thread:$0]  %s59_s25, 128, %s61_s29, [#allocation9]  }
   0xa   :  { %s623_s10 = smov [#allocation2]   ;;  %s624_s3 = smov [#allocation7]  }
   0xb   :  { %s20_s11 = sshll.u32 %s623_s10, 4  ;;  %s46_s12 = sshll.u32 %s624_s3, 4  ;;  %s21_s11 = int_to_ptr.vmem [resolvable:$true] %s20_s11  ;;  %s47_s12 = int_to_ptr.vmem [resolvable:$true] %s46_s12 }
   0xc   :  { %26 = dma.hbm_to_vmem [thread:$0]  %s19_s7, 2048, %s21_s11, [#allocation3], %s620_s26, %s620_s26, %s621_s27  }
   0xd   :  { %s68_s15 = sshll.u32 %s707_s4, 4  ;;  %s625_s0 = smov [#allocation10]   ;;  %s69_s15 = int_to_ptr.hbm [resolvable:$true] %s68_s15 }
   0xe   :  { %52 = dma.hbm_to_vmem [thread:$0]  %s45_s9, 512, %s47_s12, [#allocation6], %s620_s26, %s620_s26, %s621_s27  }
   0xf   :  { %s70_s16 = sshll.u32 %s625_s0, 4  ;;  %s71_s16 = int_to_ptr.vmem [resolvable:$true] %s70_s16 }
  0x10   :  { %76 = dma.hbm_to_vmem [thread:$0]  %s69_s15, 256, %s71_s16, [#allocation9], %s620_s26, %s620_s26, %s621_s27  }
  0x11   :  { %611 = dma.done.wait [#allocation3], 2048  }
  0x12   :  { %612 = vsyncadd [#allocation3], 4294965248 }
  0x13   :  { %613 = dma.done.wait [#allocation6], 2560  }
  0x14   :  { %614 = vsyncadd [#allocation6], 4294964736 }
  0x15   :  { %615 = dma.done.wait [#allocation9], 384  }
  0x16   :  { %616 = vsyncadd [#allocation9], 4294966912  ;;  %v674_v0 = vld [vmem:[#allocation10 + $0x8] sm:$0xff]  ;;  %v676_v1 = vld [vmem:[#allocation10] sm:$0xff]  ;;  %vm138_vm0 = vcmask 130048   ;;  %s626_s2 = smov 1  }
  0x17   :  { %v101_v2 = vld [vmem:[#allocation2 + $0x8] sm:$0xff]  ;;  %455 = vmatpush.msra.mxu3 %v674_v0  ;;  %v108_v4 = vld [vmem:[#allocation2 + $0x18] sm:$0xff]  ;;  %159 = vmatpush.msra.mxu0 %v674_v0  ;;  %v100_v13 = vld [vmem:[#allocation2] sm:$0xff]  ;;  %s627_s4 = smov 127   ;;  %s628_s17 = smov [#allocation11]  }
  0x18   :  { %v103_v3 = vld [vmem:[#allocation5 + $0x8] sm:$0xff]  ;;  %v111_v5 = vld [vmem:[#allocation5 + $0x18] sm:$0xff]  ;;  %213 = vmatpush.msra.mxu2 %v674_v0  ;;  %v102_v14 = vld [vmem:[#allocation5] sm:$0xff]  ;;  %s429_s18 = sshll.u32 %s628_s17, 4  ;;  %s431_s21 = sshll.u32 %s708_s5, 4  ;;  %s430_s18 = int_to_ptr.vmem [resolvable:$true] %s429_s18  ;;  %s432_s21 = int_to_ptr.hbm [resolvable:$true] %s431_s21 }
  0x19   :  { %v105_v6 = vsub.f32 %v101_v2, %v103_v3  ;;  %v113_v7 = vsub.f32 %v108_v4, %v111_v5  ;;  %v118_v8 = vld [vmem:[#allocation2 + $0x28] sm:$0xff]  ;;  %v128_v10 = vld [vmem:[#allocation2 + $0x38] sm:$0xff]  ;;  %456 = vmatpush.msra.mxu3 %v676_v1  ;;  %160 = vmatpush.msra.mxu0 %v676_v1  ;;  %v104_v17 = vsub.f32 %v100_v13, %v102_v14  ;;  %v107_v18 = vld [vmem:[#allocation2 + $0x10] sm:$0xff] }
  0x1a   :  { %v121_v9 = vld [vmem:[#allocation5 + $0x28] sm:$0xff]  ;;  %v131_v12 = vld [vmem:[#allocation5 + $0x38] sm:$0xff]  ;;  %v110_v19 = vld [vmem:[#allocation5 + $0x10] sm:$0xff]  ;;  %214 = vmatpush.msra.mxu2 %v676_v1 }
  0x1b   :  { %v123_v11 = vsub.f32 %v118_v8, %v121_v9  ;;  %v115_v15 = vadd.f32 %v113_v7, %v105_v6  ;;  %v133_v16 = vsub.f32 %v128_v10, %v131_v12  ;;  %v117_v20 = vld [vmem:[#allocation2 + $0x20] sm:$0xff]  ;;  %374 = vmatpush.msrb.mxu0 %v674_v0  ;;  %v112_v21 = vsub.f32 %v107_v18, %v110_v19  ;;  %v127_v23 = vld [vmem:[#allocation2 + $0x30] sm:$0xff]  ;;  %v192_v34 = vld [vmem:[#allocation7 + $0x8] sm:$0xff] }
  0x1c   :  { %v120_v22 = vld [vmem:[#allocation5 + $0x20] sm:$0xff]  ;;  %v130_v24 = vld [vmem:[#allocation5 + $0x30] sm:$0xff]  ;;  %v264_v50 = vld [vmem:[#allocation2 + $0x48] sm:$0xff] }
  0x1d   :  { %v125_v25 = vadd.f32 %v123_v11, %v115_v15  ;;  %v122_v26 = vsub.f32 %v117_v20, %v120_v22  ;;  %v191_v27 = vld [vmem:[#allocation7] sm:$0xff]  ;;  %375 = vmatpush.msrb.mxu0 %v676_v1  ;;  %v114_v28 = vadd.f32 %v112_v21, %v104_v17  ;;  %v132_v29 = vsub.f32 %v127_v23, %v130_v24  ;;  %v352_v37 = vld [vmem:[#allocation7 + $0x10] sm:$0xff]  ;;  %v267_v51 = vld [vmem:[#allocation5 + $0x48] sm:$0xff] }
  0x1e   :  { %446 = vmatmul.msk.f32.vlgmr.msra.gmra.mxu2 %vm138_vm0, %v191_v27  ;;  %v263_v36 = vld [vmem:[#allocation2 + $0x40] sm:$0xff]  ;;  %v271_v39 = vld [vmem:[#allocation2 + $0x50] sm:$0xff]  ;;  %v272_v52 = vld [vmem:[#allocation2 + $0x58] sm:$0xff]  ;;  %v269_v58 = vsub.f32 %v264_v50, %v267_v51 }
  0x1f   :  { %v135_v30 = vadd.f32 %v133_v16, %v125_v25  ;;  %v124_v31 = vadd.f32 %v122_v26, %v114_v28  ;;  %v266_v38 = vld [vmem:[#allocation5 + $0x40] sm:$0xff]  ;;  %v274_v40 = vld [vmem:[#allocation5 + $0x50] sm:$0xff]  ;;  %v275_v53 = vld [vmem:[#allocation5 + $0x58] sm:$0xff] }
  0x20   :  { %v268_v41 = vsub.f32 %v263_v36, %v266_v38  ;;  %v276_v42 = vsub.f32 %v271_v39, %v274_v40  ;;  %v281_v43 = vld [vmem:[#allocation2 + $0x60] sm:$0xff]  ;;  %v291_v48 = vld [vmem:[#allocation2 + $0x70] sm:$0xff]  ;;  %v277_v59 = vsub.f32 %v272_v52, %v275_v53  ;;  %v282_v61 = vld [vmem:[#allocation2 + $0x68] sm:$0xff] }
  0x21   :  { %v137_v32 = vmul.f32 0.25, %v135_v30  ;;  %v134_v33 = vadd.f32 %v132_v29, %v124_v31  ;;  %v284_v44 = vld [vmem:[#allocation5 + $0x60] sm:$0xff]  ;;  %v294_v49 = vld [vmem:[#allocation5 + $0x70] sm:$0xff]  ;;  %v285_v62 = vld [vmem:[#allocation5 + $0x68] sm:$0xff] }
  0x22   :  { %v278_v46 = vadd.f32 %v276_v42, %v268_v41  ;;  %v286_v47 = vsub.f32 %v281_v43, %v284_v44  ;;  %v296_v57 = vsub.f32 %v291_v48, %v294_v49  ;;  %v97_v60 = vld [vmem:[#allocation8] sm:$0xff]  ;;  %v279_v3 = vadd.f32 %v277_v59, %v269_v58  ;;  %v292_v5 = vld [vmem:[#allocation2 + $0x78] sm:$0xff] }
  0x23   :  { %444 = vmatmul.msk.f32.vlgmr.msra.gmra.mxu3 %vm138_vm0, %v137_v32  ;;  %v136_v35 = vmul.f32 0.25, %v134_v33  ;;  %v287_v4 = vsub.f32 %v282_v61, %v285_v62  ;;  %v295_v6 = vld [vmem:[#allocation5 + $0x78] sm:$0xff] }
  0x24   :  { %v288_v56 = vadd.f32 %v286_v47, %v278_v46  ;;  %v297_v9 = vsub.f32 %v292_v5, %v295_v6  ;;  %v353_v12 = vld [vmem:[#allocation7 + $0x18] sm:$0xff] }
  0x25   :  { %443 = vmatmul.msk.f32.vlgmr.msra.gmra.mxu0 %vm138_vm0, %v136_v35  ;;  %v289_v8 = vadd.f32 %v287_v4, %v279_v3 }
  0x26   :  { %447 = vmatmul.msk.f32.gmra.mxu2 %vm138_vm0, %v192_v34  ;;  %v298_v2 = vadd.f32 %v296_v57, %v288_v56 }
  0x27   :  { %v299_v10 = vadd.f32 %v297_v9, %v289_v8 }
  0x28   :  { %v300_v7 = vmul.f32 0.25, %v298_v2 }
  0x29   :  { %v301_v11 = vmul.f32 0.25, %v299_v10 }
  0x2d   :  { %452 = vmatmul.msk.f32.vlgmr.msrb.gmra.mxu0 %vm138_vm0, %v352_v37 }
  0x35   :  { %453 = vmatmul.msk.f32.gmra.mxu0 %vm138_vm0, %v353_v12 }
  0xa1   :  { %v216_v45 = vpop.f32.mrf.mxu2 }
  0xa2   :  { %v162_v55 = vpop.f32.mrf.mxu0 }
  0xa6   :  { %v165_v54 = vpop.f32.mrf.mxu3 }
  0xa7   :  { %185 = vmatpush.msra.mxu1 %v165_v54 }
  0xa9   :  { %186 = vmatpush.msra.mxu1 %v162_v55  ;;  %v219_v63 = vpop.f32.mrf.mxu2 }
  0xaa   :  { %445 = vmatmul.msk.f32.vlgmr.msra.gmra.mxu1 %vm138_vm0, %v97_v60  ;;  %236 = vmatpush.msrb.mxu3 %v219_v63  ;;  %v377_v14 = vpop.f32.mrf.mxu0 }
  0xab   :  { %322 = vmatpush.msrb.mxu1 %v674_v0 }
  0xac   :  { %237 = vmatpush.msrb.mxu3 %v216_v45 }
  0xad   :  { %323 = vmatpush.msrb.mxu1 %v676_v1  ;;  %448 = vmatmul.msk.f32.vlgmr.msrb.gmra.mxu3 %vm138_vm0, %v97_v60 }
  0xb2   :  { %449 = vmatmul.msk.f32.vlgmr.msrb.gmra.mxu1 %vm138_vm0, %v300_v7  ;;  %v380_v15 = vpop.f32.mrf.mxu0 }
  0xb3   :  { %397 = vmatpush.msrb.mxu2 %v380_v15 }
  0xb5   :  { %398 = vmatpush.msrb.mxu2 %v377_v14 }
  0xb6   :  { %454 = vmatmul.msk.f32.vlgmr.msrb.gmra.mxu2 %vm138_vm0, %v97_v60 }
  0xba   :  { %450 = vmatmul.msk.f32.gmra.mxu1 %vm138_vm0, %v301_v11 }
 0x127   :  { %v188_v0 = vpop.f32.mrf.mxu1 }
 0x128   :  { %242 = vrot.lane.b32.xlu0 %v188_v0, %s626_s2  ;;  %v252_v23 = vrot.slane %v188_v0, 7  ;;  %v256_v27 = vrot.slane %v188_v0, 1 }
 0x12a   :  { %v253_v26 = vsub.f32 %v188_v0, %v252_v23  ;;  %v257_v34 = vsub.f32 %v188_v0, %v256_v27 }
 0x12c   :  { %v254_v33 = vmul.f32 %v253_v26, %v253_v26  ;;  %v258_v41 = vmul.f32 %v257_v34, %v257_v34 }
 0x12f   :  { %v325_v13 = vpop.f32.mrf.mxu1 }
 0x130   :  { %247 = vrot.lane.b32.xlu0 %v188_v0, %s627_s4  ;;  %v239_v16 = vpop.f32.mrf.mxu3 }
 0x137   :  { %v328_v1 = vpop.f32.mrf.mxu1 }
 0x138   :  { %345 = vmatpush.msra.mxu3 %v328_v1 }
 0x139   :  { %v400_v47 = vpop.f32.mrf.mxu2 }
 0x13a   :  { %346 = vmatpush.msra.mxu3 %v325_v13 }
 0x13b   :  { %451 = vmatmul.msk.f32.vlgmr.msra.gmra.mxu3 %vm138_vm0, %v97_v60 }
 0x19a   :  { %v243_v18 = vpop.permute.xlu0 %242 }
 0x19b   :  { %v244_v22 = vsub.f32 %v188_v0, %v243_v18 }
 0x19d   :  { %v245_v25 = vmul.f32 %v244_v22, %v244_v22 }
 0x1a2   :  { %v248_v19 = vpop.permute.xlu0 %247 }
 0x1a3   :  { %v249_v20 = vsub.f32 %v188_v0, %v248_v19 }
 0x1a5   :  { %v250_v24 = vmul.f32 %v249_v20, %v249_v20 }
 0x1a7   :  { %v251_v29 = vadd.f32 %v250_v24, %v245_v25 }
 0x1a9   :  { %v255_v37 = vadd.f32 %v254_v33, %v251_v29 }
 0x1ab   :  { %v259_v44 = vadd.f32 %v258_v41, %v255_v37 }
 0x1ad   :  { %v260_v49 = vmul.f32 %v259_v44, %v239_v16 }
 0x1be   :  { %v348_v17 = vpop.f32.mrf.mxu3 }
 0x1bf   :  { %403 = vrot.lane.b32.xlu1 %v348_v17, %s626_s2  ;;  %v413_v28 = vrot.slane %v348_v17, 7  ;;  %v417_v31 = vrot.slane %v348_v17, 1 }
 0x1c1   :  { %v414_v36 = vsub.f32 %v348_v17, %v413_v28  ;;  %v418_v40 = vsub.f32 %v348_v17, %v417_v31 }
 0x1c3   :  { %v415_v43 = vmul.f32 %v414_v36, %v414_v36  ;;  %v419_v46 = vmul.f32 %v418_v40, %v418_v40 }
 0x1c7   :  { %408 = vrot.lane.b32.xlu1 %v348_v17, %s627_s4 }
 0x231   :  { %v404_v21 = vpop.permute.xlu1 %403 }
 0x232   :  { %v405_v30 = vsub.f32 %v348_v17, %v404_v21 }
 0x234   :  { %v406_v38 = vmul.f32 %v405_v30, %v405_v30 }
 0x239   :  { %v409_v32 = vpop.permute.xlu1 %408 }
 0x23a   :  { %v410_v35 = vsub.f32 %v348_v17, %v409_v32 }
 0x23c   :  { %v411_v39 = vmul.f32 %v410_v35, %v410_v35 }
 0x23e   :  { %v412_v42 = vadd.f32 %v411_v39, %v406_v38 }
 0x240   :  { %v416_v45 = vadd.f32 %v415_v43, %v412_v42 }
 0x242   :  { %v420_v48 = vadd.f32 %v419_v46, %v416_v45 }
 0x244   :  { %v421_v50 = vmul.f32 %v420_v48, %v400_v47 }
 0x246   :  { %v422_v51 = vadd.f32 %v421_v50, %v260_v49 }
 0x248   :  { %423 = vst [vmem:[#allocation11] sm:$0xff] %v422_v51 }
 0x249   :  { %434 = dma.vmem_to_hbm [thread:$0]  %s430_s18, 128, %s432_s21, [#allocation4]  }
 0x24a   :  { %617 = dma.done.wait [#allocation4], 128  }
 0x24b   :  { %618 = vsyncadd [#allocation4], 4294967168 }
 0x24c   :  { %439 = vsyncpa [#allocation3], 1 }
 0x24d   :  { %440 = vsyncpa [#allocation6], 1 }
 0x24e   :  { %441 = vsyncpa [#allocation9], 1 }
 0x24f   :  { %442 = vsyncpa [#allocation4], 1 }

</bundles_post_ra>
